<compile_context>
chip_gen: v5e
topology: v5e:2x2
jax: 0.10.0
libtpu: 0.0.40
codegen_flags: <defaults>
</compile_context>

<pallas_src>
import numpy as np
import jax
import jax.numpy as jnp
from jax.experimental import pallas as pl
from jax.experimental.pallas import tpu as pltpu


# ---------------------------------------------------------------------------
# Pallas kernel: out[b, k, p] = sum_c w[k, c, p] * x[b, c, p]
# ---------------------------------------------------------------------------
def abc2d_kernel(w_ref, x_ref, o_ref):
    # w_ref: (Kpp, CK, tp)   x_ref: (B, CK, tp)   o_ref: (B, Kpp, tp)
    # P is the last (lane) axis; CK sits on sublanes, so the reduction is a
    # cheap cross-sublane sum. Everything runs on the VPU (no MXU starvation).
    w = w_ref[...]                                     # (Kpp, CK, tp)
    B = x_ref.shape[0]
    for b in range(B):                                 # B is small & static
        xb = x_ref[b]                                  # (CK, tp)
        prod = w * xb[None, :, :]                      # (Kpp, CK, tp)
        o_ref[b] = jnp.sum(prod, axis=1).astype(o_ref.dtype)   # (Kpp, tp)


def _choose_tile_p(P, Kpp, CK, B, itemsize):
    """Pick the pixel-tile width.

    Single grid step whenever the whole problem comfortably fits VMEM
    (removes all per-step overhead); otherwise tile along P with
    multiple-of-128 (lane-aligned) blocks so the 'parallel' pixel axis can
    shard across v7x's two TensorCores. Budget is conservative enough for
    v7x's 64 MiB physical / 32 MiB scoped VMEM with double buffering.
    """
    bytes_per_p = itemsize * (Kpp * CK + B * CK + B * Kpp)
    budget = 8 * 1024 * 1024                      # per-block budget (pre 2x buffering)
    if 2 * P * bytes_per_p <= budget:
        return P                                  # grid=(1,) -> no per-step overhead
    t = (budget // (2 * bytes_per_p)) // 128 * 128
    while t >= 128:
        if P % t == 0:
            return t
        t -= 128
    # No lane-aligned divisor found; fall back to full extent (always legal).
    return P


def abc2d_forward(weights_kcp, x_bcp, *, tile_p=None):
    """weights_kcp: (Kpp, CK, P) kernel-layout weights.
    x_bcp: (B, CK, P) gathered activations (already in kernel layout).
    Returns (B, Kpp, P) exactly matching ABC_2D.forward."""
    Kpp, CK, P = weights_kcp.shape
    B, CK2, P2 = x_bcp.shape
    assert CK2 == CK and P2 == P

    if tile_p is None:
        tile_p = _choose_tile_p(P, Kpp, CK, B,
                                jnp.dtype(weights_kcp.dtype).itemsize)
    assert P % tile_p == 0
    grid = (P // tile_p,)

    return pl.pallas_call(
        abc2d_kernel,
        out_shape=jax.ShapeDtypeStruct((B, Kpp, P), weights_kcp.dtype),
        grid_spec=pltpu.PrefetchScalarGridSpec(
            num_scalar_prefetch=0,
            grid=grid,
            in_specs=[
                pl.BlockSpec((Kpp, CK, tile_p), lambda i: (0, 0, i)),
                pl.BlockSpec((B, CK, tile_p), lambda i: (0, 0, i)),
            ],
            out_specs=pl.BlockSpec((B, Kpp, tile_p), lambda i: (0, 0, i)),
        ),
        compiler_params=pltpu.CompilerParams(
            dimension_semantics=("parallel",),
            vmem_limit_bytes=32 * 1024 * 1024,
        ),
    )(weights_kcp, x_bcp)


# ---------------------------------------------------------------------------
# Layout / gather plumbing (plain JAX glue, no extra transposes on hot path)
# ---------------------------------------------------------------------------
def pack_weights(weights_pkc):
    """(P, Kpp, CK) torch-parameter layout -> (Kpp, CK, P) kernel layout.
    One-time layout change; in a real model do this at parameter-load time."""
    return jnp.transpose(weights_pkc, (1, 2, 0))


def build_hashtable(H, W, C, kh, kw):
    """Synthetic deterministic hash: per pixel an (C, kh*kw) table of flat
    indices into a single H*W channel plane (wrap-around window)."""
    table = {}
    for i in range(H):
        for j in range(W):
            idx = [((i + di) % H) * W + ((j + dj) % W)
                   for di in range(kh) for dj in range(kw)]
            idx = np.asarray(idx, dtype=np.int64)
            table[(i, j)] = np.tile(idx[None, :], (C, 1))
    return table


def build_gather_indices(hashtable, C, H, W):
    """Flatten the hash dict once into an int32 (C*K, P) index table so the
    gather lands directly in the kernel's (B, CK, P) layout (no transposes)."""
    keys = list(hashtable.keys())
    P = len(keys)
    K = hashtable[keys[0]].shape[1]
    idx = np.empty((C * K, P), dtype=np.int32)
    for p, key in enumerate(keys):
        per_pixel = hashtable[key]                     # (C, K)
        for c in range(C):
            idx[c * K:(c + 1) * K, p] = per_pixel[c] + H * W * c
    return jnp.asarray(idx)


def img_reconstruction_bcp(img, idx_ckp):
    """img: (B, C, H, W) -> (B, C*K, P). Same values as the torch
    img_reconstruction, but emitted directly in the kernel layout.
    # TODO(synk): fuse this gather into the kernel (scalar-prefetched indices
    # + manual DMA) for large images to avoid the HBM round-trip."""
    B = img.shape[0]
    flat = img.reshape(B, -1)                          # (B, C*H*W)
    return jnp.take(flat, idx_ckp, axis=1)             # (B, CK, P)


# ---------------------------------------------------------------------------
# Pure-JAX reference that mirrors the torch module exactly
# ---------------------------------------------------------------------------
def reference_forward(weights_pkc, img, hashtable):
    B, C, H, W = img.shape
    single = np.concatenate([hashtable[key][c] + H * W * c
                             for key in hashtable.keys() for c in range(C)])
    all_idx = np.concatenate([single + H * W * C * b for b in range(B)])
    x = jnp.take(img.reshape(-1), jnp.asarray(all_idx))
    x = jnp.transpose(x.reshape(B, H * W, -1), (1, 2, 0))      # (P, CK, B)
    wx = jnp.einsum("pkc,pcb->pkb", weights_pkc, x)            # (P, Kpp, B)
    return jnp.transpose(wx, (2, 1, 0))                        # (B, Kpp, P)


if __name__ == "__main__":
    # Small shapes consistent with the module.
    B, C, H, W = 2, 4, 16, 16
    kh = kw = 2
    kernel_size = kh * kw                   # K = 4
    pixel_number = H * W                    # P = 256
    kernel_number_per_pixel = 8             # Kpp
    CK = C * kernel_size                    # 16

    key = jax.random.PRNGKey(0)
    k_w, k_x = jax.random.split(key)
    # nn.init.normal_(self.weights): (P, Kpp, C*K)
    weights_pkc = jax.random.normal(
        k_w, (pixel_number, kernel_number_per_pixel, CK), dtype=jnp.float32)
    x = jax.random.normal(k_x, (B, C, H, W), dtype=jnp.float32)

    hashtable = build_hashtable(H, W, C, kh, kw)
    idx_ckp = build_gather_indices(hashtable, C, H, W)     # static per layer
    weights_kcp = pack_weights(weights_pkc)                # one-time repack

    x_bcp = img_reconstruction_bcp(x, idx_ckp)             # (B, CK, P)
    out = abc2d_forward(weights_kcp, x_bcp)                # (B, Kpp, P)
    out = jax.block_until_ready(out)

    ref = reference_forward(weights_pkc, x, hashtable)
    assert out.shape == (B, kernel_number_per_pixel, pixel_number)
    np.testing.assert_allclose(np.asarray(out), np.asarray(ref),
                               rtol=1e-5, atol=1e-5)
    print("KERNEL_OK")
</pallas_src>

<mosaic_0001>
module attributes {stable_mosaic.version = 11 : i64} {
  func.func @abc2d_kernel(%arg0: i32, %arg1: memref<8x16x256xf32, #tpu.memory_space<vmem>>, %arg2: memref<2x16x256xf32, #tpu.memory_space<vmem>>, %arg3: memref<2x8x256xf32, #tpu.memory_space<vmem>>) attributes {dimension_semantics = [#tpu.dimension_semantics<parallel>], iteration_bounds = array<i64: 1>, scalar_prefetch = 0 : i64, scratch_operands = 0 : i64, tpu.core_type = #tpu.core_type<tc>, window_params = [{transform_indices = @transform_0, window_bounds = array<i64: 8, 16, 256>}, {transform_indices = @transform_1, window_bounds = array<i64: 2, 16, 256>}, {transform_indices = @transform_2, window_bounds = array<i64: 2, 8, 256>}]} {
    %c0 = arith.constant 0 : index
    %c0_0 = arith.constant 0 : index
    %c0_1 = arith.constant 0 : index
    %0 = vector.load %arg1[%c0, %c0_0, %c0_1] : memref<8x16x256xf32, #tpu.memory_space<vmem>>, vector<8x16x256xf32>
    %c0_2 = arith.constant 0 : index
    %c0_3 = arith.constant 0 : index
    %c0_4 = arith.constant 0 : index
    %1 = vector.load %arg2[%c0_2, %c0_3, %c0_4] : memref<2x16x256xf32, #tpu.memory_space<vmem>>, vector<1x16x256xf32>
    %2 = vector.shape_cast %1 : vector<1x16x256xf32> to vector<16x256xf32>
    %3 = vector.shape_cast %2 : vector<16x256xf32> to vector<1x16x256xf32>
    %4 = vector.broadcast %3 : vector<1x16x256xf32> to vector<8x16x256xf32>
    %5 = arith.mulf %0, %4 : vector<8x16x256xf32>
    %cst = arith.constant dense<0.000000e+00> : vector<8x256xf32>
    %6 = vector.multi_reduction <add>, %5, %cst [1] : vector<8x16x256xf32> to vector<8x256xf32>
    %c0_5 = arith.constant 0 : index
    %c0_6 = arith.constant 0 : index
    %c0_7 = arith.constant 0 : index
    %7 = vector.load %arg3[%c0_5, %c0_6, %c0_7] : memref<2x8x256xf32, #tpu.memory_space<vmem>>, vector<1x8x256xf32>
    %8 = vector.shape_cast %7 : vector<1x8x256xf32> to vector<8x256xf32>
    %9 = vector.shape_cast %6 : vector<8x256xf32> to vector<1x8x256xf32>
    tpu.vector_store %arg3[%c0_5, %c0_6, %c0_7], %9 {strides = array<i32>} : memref<2x8x256xf32, #tpu.memory_space<vmem>>, vector<1x8x256xf32>,
    %c1 = arith.constant 1 : index
    %c0_8 = arith.constant 0 : index
    %c0_9 = arith.constant 0 : index
    %10 = vector.load %arg2[%c1, %c0_8, %c0_9] : memref<2x16x256xf32, #tpu.memory_space<vmem>>, vector<1x16x256xf32>
    %11 = vector.shape_cast %10 : vector<1x16x256xf32> to vector<16x256xf32>
    %12 = vector.shape_cast %11 : vector<16x256xf32> to vector<1x16x256xf32>
    %13 = vector.broadcast %12 : vector<1x16x256xf32> to vector<8x16x256xf32>
    %14 = arith.mulf %0, %13 : vector<8x16x256xf32>
    %cst_10 = arith.constant dense<0.000000e+00> : vector<8x256xf32>
    %15 = vector.multi_reduction <add>, %14, %cst_10 [1] : vector<8x16x256xf32> to vector<8x256xf32>
    %c1_11 = arith.constant 1 : index
    %c0_12 = arith.constant 0 : index
    %c0_13 = arith.constant 0 : index
    %16 = vector.load %arg3[%c1_11, %c0_12, %c0_13] : memref<2x8x256xf32, #tpu.memory_space<vmem>>, vector<1x8x256xf32>
    %17 = vector.shape_cast %16 : vector<1x8x256xf32> to vector<8x256xf32>
    %18 = vector.shape_cast %15 : vector<8x256xf32> to vector<1x8x256xf32>
    tpu.vector_store %arg3[%c1_11, %c0_12, %c0_13], %18 {strides = array<i32>} : memref<2x8x256xf32, #tpu.memory_space<vmem>>, vector<1x8x256xf32>,
    return
  }
  func.func @transform_0(%arg0: i32) -> (i32, i32, i32) {
    %c0_i32 = arith.constant 0 : i32
    %c0_i32_0 = arith.constant 0 : i32
    %c0_i32_1 = arith.constant 0 : i32
    return %c0_i32, %c0_i32_0, %arg0 : i32, i32, i32
  }
  func.func @transform_1(%arg0: i32) -> (i32, i32, i32) {
    %c0_i32 = arith.constant 0 : i32
    %c0_i32_0 = arith.constant 0 : i32
    %c0_i32_1 = arith.constant 0 : i32
    return %c0_i32, %c0_i32_0, %arg0 : i32, i32, i32
  }
  func.func @transform_2(%arg0: i32) -> (i32, i32, i32) {
    %c0_i32 = arith.constant 0 : i32
    %c0_i32_0 = arith.constant 0 : i32
    %c0_i32_1 = arith.constant 0 : i32
    return %c0_i32, %c0_i32_0, %arg0 : i32, i32, i32
  }
}

</mosaic_0001>

<bundles_post_ra>
// kernel: tpu_custom_call.1
= control target key start
LH: loop header
LB: loop body
LE: loop exit
PB: predicated region body
PF: predicated region fallthrough
CT: control target
= control target key end

     0   :  { %7 = vsyncpa [#allocation3], 0  ;;  %s746_s0 = inlined_call_operand.hbm [shape: f32[8,16,256], index: 0, kind: input, shape index: {}]   ;;  %s747_s1 = inlined_call_operand.hbm [shape: f32[2,16,256], index: 1, kind: input, shape index: {}]   ;;  %s748_s2 = inlined_call_operand.hbm [shape: f32[2,8,256], index: 2, kind: output, shape index: {}]  }
   0x1   :  { %8 = vsyncpa [#allocation6], 0 }
   0x2   :  { %9 = vsyncpa [#allocation4], 0  ;;  %s14_s11 = sshll.u32 %s746_s0, 4  ;;  %s552_s12 = smov [#allocation2]   ;;  %s15_s11 = int_to_ptr.hbm [resolvable:$true] %s14_s11 }
   0x3   :  { %s16_s13 = sshll.u32 %s552_s12, 4  ;;  %s27_s16 = sshll.u32 %s747_s1, 4  ;;  %s17_s13 = int_to_ptr.vmem [resolvable:$true] %s16_s13  ;;  %s28_s16 = int_to_ptr.hbm [resolvable:$true] %s27_s16 }
   0x4   :  { %s553_s17 = smov 256   ;;  %s554_s18 = smov 16  }
   0x5   :  { %22 = dma.hbm_to_vmem [thread:$0]  %s15_s11, 4096, %s17_s13, [#allocation3], %s553_s17, %s553_s17, %s554_s18  }
   0x6   :  { %s555_s19 = smov [#allocation5]  }
   0x7   :  { %s29_s20 = sshll.u32 %s555_s19, 4  ;;  %s30_s20 = int_to_ptr.vmem [resolvable:$true] %s29_s20 }
   0x8   :  { %35 = dma.hbm_to_vmem [thread:$0]  %s28_s16, 1024, %s30_s20, [#allocation6], %s553_s17, %s553_s17, %s554_s18  }
   0x9   :  { %546 = dma.done.wait [#allocation3], 4096  }
   0xa   :  { %547 = vsyncadd [#allocation3], 4294963200 }
   0xb   :  { %548 = dma.done.wait [#allocation6], 1024  }
   0xc   :  { %549 = vsyncadd [#allocation6], 4294966272  ;;  %v584_v0 = vld [vmem:[#allocation2] sm:$0xff]  ;;  %v586_v1 = vld [vmem:[#allocation2 + $0x10] sm:$0xff]  ;;  %vm240_vm0 = vcmask 1041409   ;;  %vm242_vm1 = vcmask 1042434  }
   0xd   :  { %v588_v2 = vld [vmem:[#allocation2 + $0x20] sm:$0xff]  ;;  %v590_v3 = vld [vmem:[#allocation2 + $0x30] sm:$0xff]  ;;  %vm244_vm2 = vcmask 1043459   ;;  %vm246_vm3 = vcmask 1044484   ;;  %vm248_vm4 = vcmask 1045509   ;;  %vm250_vm5 = vcmask 1046534  }
   0xe   :  { %v592_v4 = vld [vmem:[#allocation2 + $0x40] sm:$0xff]  ;;  %v594_v5 = vld [vmem:[#allocation2 + $0x50] sm:$0xff]  ;;  %vm252_vm6 = vcmask 1047559   ;;  %s556_s0 = smov [#allocation7]   ;;  %s455_s23 = sshll.u32 %s748_s2, 4  ;;  %s456_s23 = int_to_ptr.hbm [resolvable:$true] %s455_s23 }
   0xf   :  { %v596_v6 = vld [vmem:[#allocation2 + $0x60] sm:$0xff]  ;;  %v598_v7 = vld [vmem:[#allocation2 + $0x70] sm:$0xff]  ;;  %s453_s1 = sshll.u32 %s556_s0, 4  ;;  %s454_s1 = int_to_ptr.vmem [resolvable:$true] %s453_s1 }
  0x10   :  { %v600_v8 = vld [vmem:[#allocation2 + $0x80] sm:$0xff]  ;;  %v602_v9 = vld [vmem:[#allocation2 + $0x90] sm:$0xff] }
  0x11   :  { %v604_v10 = vld [vmem:[#allocation2 + $0xa0] sm:$0xff]  ;;  %v606_v11 = vld [vmem:[#allocation2 + $0xb0] sm:$0xff] }
  0x12   :  { %v608_v12 = vld [vmem:[#allocation2 + $0xc0] sm:$0xff]  ;;  %v78_v14 = vld [vmem:[#allocation5 + $0x10] sm:$0xff] }
  0x13   :  { %v76_v13 = vld [vmem:[#allocation5] sm:$0xff]  ;;  %v610_v15 = vld [vmem:[#allocation2 + $0xd0] sm:$0xff]  ;;  %v82_v19 = vmul.f32 %v78_v14, %v586_v1  ;;  %v86_v21 = vmul.f32 %v78_v14, %v590_v3  ;;  %v90_v23 = vmul.f32 %v78_v14, %v594_v5  ;;  %v94_v25 = vmul.f32 %v78_v14, %v598_v7 }
  0x14   :  { %v612_v16 = vld [vmem:[#allocation2 + $0xe0] sm:$0xff]  ;;  %v614_v17 = vld [vmem:[#allocation2 + $0xf0] sm:$0xff]  ;;  %v80_v18 = vmul.f32 %v76_v13, %v584_v0  ;;  %v84_v20 = vmul.f32 %v76_v13, %v588_v2  ;;  %v88_v22 = vmul.f32 %v76_v13, %v592_v4  ;;  %v92_v24 = vmul.f32 %v76_v13, %v596_v6 }
  0x15   :  { %v96_v26 = vmul.f32 %v76_v13, %v600_v8  ;;  %v98_v27 = vmul.f32 %v78_v14, %v602_v9  ;;  %v100_v28 = vmul.f32 %v76_v13, %v604_v10  ;;  %v102_v29 = vmul.f32 %v78_v14, %v606_v11 }
  0x16   :  { %v104_v30 = vmul.f32 %v76_v13, %v608_v12  ;;  %v106_v31 = vmul.f32 %v78_v14, %v610_v15  ;;  %v108_v32 = vmul.f32 %v76_v13, %v612_v16  ;;  %v110_v33 = vmul.f32 %v78_v14, %v614_v17 }
  0x17   :  { %v112_v34 = vadd.f32 %v82_v19, %v80_v18  ;;  %v126_v35 = vadd.f32 %v86_v21, %v84_v20  ;;  %v140_v36 = vadd.f32 %v90_v23, %v88_v22  ;;  %v154_v37 = vadd.f32 %v94_v25, %v92_v24 }
  0x18   :  { %v168_v38 = vadd.f32 %v98_v27, %v96_v26  ;;  %v182_v39 = vadd.f32 %v102_v29, %v100_v28  ;;  %v196_v40 = vadd.f32 %v106_v31, %v104_v30  ;;  %v210_v41 = vadd.f32 %v110_v33, %v108_v32  ;;  %v632_v26 = vld [vmem:[#allocation2 + $0x8] sm:$0xff]  ;;  %v634_v31 = vld [vmem:[#allocation2 + $0x18] sm:$0xff] }
  0x19   :  { %v113_v42 = vrot.slane %v112_v34, 4  ;;  %v127_v43 = vrot.slane %v126_v35, 4  ;;  %v141_v44 = vrot.slane %v140_v36, 4  ;;  %v155_v45 = vrot.slane %v154_v37, 4  ;;  %v636_v32 = vld [vmem:[#allocation2 + $0x28] sm:$0xff] }
  0x1a   :  { %v169_v46 = vrot.slane %v168_v38, 4  ;;  %v183_v47 = vrot.slane %v182_v39, 4  ;;  %v197_v48 = vrot.slane %v196_v40, 4  ;;  %v211_v49 = vrot.slane %v210_v41, 4 }
  0x1b   :  { %v114_v50 = vadd.f32 %v113_v42, %v112_v34  ;;  %v128_v51 = vadd.f32 %v127_v43, %v126_v35  ;;  %v142_v52 = vadd.f32 %v141_v44, %v140_v36  ;;  %v156_v53 = vadd.f32 %v155_v45, %v154_v37  ;;  %v77_v37 = vld [vmem:[#allocation5 + $0x8] sm:$0xff]  ;;  %v638_v43 = vld [vmem:[#allocation2 + $0x38] sm:$0xff] }
  0x1c   :  { %v170_v54 = vadd.f32 %v169_v46, %v168_v38  ;;  %v184_v55 = vadd.f32 %v183_v47, %v182_v39  ;;  %v198_v56 = vadd.f32 %v197_v48, %v196_v40  ;;  %v212_v57 = vadd.f32 %v211_v49, %v210_v41  ;;  %v79_v38 = vld [vmem:[#allocation5 + $0x18] sm:$0xff]  ;;  %v640_v44 = vld [vmem:[#allocation2 + $0x48] sm:$0xff] }
  0x1d   :  { %v115_v58 = vrot.slane %v114_v50, 2  ;;  %v129_v59 = vrot.slane %v128_v51, 2  ;;  %v143_v60 = vrot.slane %v142_v52, 2  ;;  %v157_v61 = vrot.slane %v156_v53, 2  ;;  %v642_v45 = vld [vmem:[#allocation2 + $0x58] sm:$0xff] }
  0x1e   :  { %v171_v62 = vrot.slane %v170_v54, 2  ;;  %v185_v63 = vrot.slane %v184_v55, 2  ;;  %v199_v13 = vrot.slane %v198_v56, 2  ;;  %v213_v14 = vrot.slane %v212_v57, 2 }
  0x1f   :  { %v116_v18 = vadd.f32 %v115_v58, %v114_v50  ;;  %v130_v19 = vadd.f32 %v129_v59, %v128_v51  ;;  %v144_v20 = vadd.f32 %v143_v60, %v142_v52  ;;  %v158_v21 = vadd.f32 %v157_v61, %v156_v53  ;;  %v644_v50 = vld [vmem:[#allocation2 + $0x68] sm:$0xff]  ;;  %v646_v51 = vld [vmem:[#allocation2 + $0x78] sm:$0xff] }
  0x20   :  { %v172_v22 = vadd.f32 %v171_v62, %v170_v54  ;;  %v186_v23 = vadd.f32 %v185_v63, %v184_v55  ;;  %v200_v24 = vadd.f32 %v199_v13, %v198_v56  ;;  %v214_v25 = vadd.f32 %v213_v14, %v212_v57  ;;  %v648_v52 = vld [vmem:[#allocation2 + $0x88] sm:$0xff]  ;;  %v651_v54 = vld [vmem:[#allocation2 + $0x98] sm:$0xff] }
  0x21   :  { %v117_v27 = vrot.slane %v116_v18, 1  ;;  %v131_v28 = vrot.slane %v130_v19, 1  ;;  %v145_v29 = vrot.slane %v144_v20, 1  ;;  %v159_v30 = vrot.slane %v158_v21, 1  ;;  %v653_v55 = vld [vmem:[#allocation2 + $0xa8] sm:$0xff]  ;;  %v655_v56 = vld [vmem:[#allocation2 + $0xb8] sm:$0xff] }
  0x22   :  { %v173_v33 = vrot.slane %v172_v22, 1  ;;  %v187_v34 = vrot.slane %v186_v23, 1  ;;  %v201_v35 = vrot.slane %v200_v24, 1  ;;  %v215_v36 = vrot.slane %v214_v25, 1  ;;  %753 = vst [vmem:[#allocation11_spill] sm:$0xff] %v655_v56  ;;  %v661_v61 = vld [vmem:[#allocation2 + $0xc8] sm:$0xff] }
  0x23   :  { %v118_v39 = vadd.f32 %v117_v27, %v116_v18  ;;  %v132_v40 = vadd.f32 %v131_v28, %v130_v19  ;;  %v146_v41 = vadd.f32 %v145_v29, %v144_v20  ;;  %v160_v42 = vadd.f32 %v159_v30, %v158_v21  ;;  %754 = vst [vmem:[#allocation12_spill] sm:$0xff] %v661_v61  ;;  %v663_v62 = vld [vmem:[#allocation2 + $0xd8] sm:$0xff]  ;;  %v665_v63 = vld [vmem:[#allocation2 + $0xe8] sm:$0xff] }
  0x24   :  { %v174_v46 = vadd.f32 %v173_v33, %v172_v22  ;;  %v188_v47 = vadd.f32 %v187_v34, %v186_v23  ;;  %v202_v48 = vadd.f32 %v201_v35, %v200_v24  ;;  %v216_v49 = vadd.f32 %v215_v36, %v214_v25  ;;  %755 = vst [vmem:[#allocation13_spill] sm:$0xff] %v663_v62  ;;  %v671_v20 = vld [vmem:[#allocation2 + $0xf8] sm:$0xff] }
  0x25   :  { %v241_v53 = vsel %vm240_vm0, %v132_v40, %v118_v39  ;;  %v81_v57 = vmul.f32 %v77_v37, %v632_v26  ;;  %v83_v58 = vmul.f32 %v79_v38, %v634_v31  ;;  %v85_v59 = vmul.f32 %v77_v37, %v636_v32  ;;  %756 = vst [vmem:[#allocation14_spill] sm:$0xff] %v665_v63 }
  0x26   :  { %v243_v60 = vsel %vm242_vm1, %v146_v41, %v241_v53  ;;  %v87_v13 = vmul.f32 %v79_v38, %v638_v43  ;;  %v89_v14 = vmul.f32 %v77_v37, %v640_v44  ;;  %v91_v18 = vmul.f32 %v79_v38, %v642_v45 }
  0x27   :  { %v245_v19 = vsel %vm244_vm2, %v160_v42, %v243_v60  ;;  %v93_v21 = vmul.f32 %v77_v37, %v644_v50  ;;  %v95_v22 = vmul.f32 %v79_v38, %v646_v51  ;;  %v97_v23 = vmul.f32 %v77_v37, %v648_v52 }
  0x28   :  { %v247_v24 = vsel %vm246_vm3, %v174_v46, %v245_v19  ;;  %v99_v25 = vmul.f32 %v79_v38, %v651_v54  ;;  %v101_v27 = vmul.f32 %v77_v37, %v653_v55  ;;  %v103_v28 = vmul.f32 %v79_v38, %v655_v56 }
  0x29   :  { %v249_v29 = vsel %vm248_vm4, %v188_v47, %v247_v24  ;;  %v105_v30 = vmul.f32 %v77_v37, %v661_v61  ;;  %v107_v33 = vmul.f32 %v79_v38, %v663_v62  ;;  %v109_v34 = vmul.f32 %v77_v37, %v665_v63 }
  0x2a   :  { %v251_v35 = vsel %vm250_vm5, %v202_v48, %v249_v29  ;;  %v111_v36 = vmul.f32 %v79_v38, %v671_v20  ;;  %v119_v39 = vadd.f32 %v83_v58, %v81_v57  ;;  %v133_v40 = vadd.f32 %v87_v13, %v85_v59 }
  0x2b   :  { %v253_v41 = vsel %vm252_vm6, %v216_v49, %v251_v35  ;;  %v147_v42 = vadd.f32 %v91_v18, %v89_v14  ;;  %v161_v46 = vadd.f32 %v95_v22, %v93_v21  ;;  %v175_v53 = vadd.f32 %v99_v25, %v97_v23 }
  0x2c   :  { %263 = vst [vmem:[#allocation7] sm:$0xff] %v253_v41  ;;  %v120_v60 = vrot.slane %v119_v39, 4  ;;  %v134_v47 = vrot.slane %v133_v40, 4  ;;  %v189_v19 = vadd.f32 %v103_v28, %v101_v27  ;;  %v203_v24 = vadd.f32 %v107_v33, %v105_v30 }
  0x2d   :  { %v148_v61 = vrot.slane %v147_v42, 4  ;;  %v162_v62 = vrot.slane %v161_v46, 4  ;;  %v176_v56 = vrot.slane %v175_v53, 4  ;;  %v217_v37 = vadd.f32 %v111_v36, %v109_v34 }
  0x2e   :  { %v121_v63 = vadd.f32 %v120_v60, %v119_v39  ;;  %v135_v48 = vadd.f32 %v134_v47, %v133_v40  ;;  %v190_v29 = vrot.slane %v189_v19, 4  ;;  %v204_v38 = vrot.slane %v203_v24, 4  ;;  %v266_v47 = vld [vmem:[#allocation5 + $0x20] sm:$0xff] }
  0x2f   :  { %v149_v57 = vadd.f32 %v148_v61, %v147_v42  ;;  %v163_v58 = vadd.f32 %v162_v62, %v161_v46  ;;  %v177_v59 = vadd.f32 %v176_v56, %v175_v53  ;;  %v218_v49 = vrot.slane %v217_v37, 4 }
  0x30   :  { %v122_v13 = vrot.slane %v121_v63, 2  ;;  %v136_v14 = vrot.slane %v135_v48, 2  ;;  %v191_v18 = vadd.f32 %v190_v29, %v189_v19  ;;  %v205_v21 = vadd.f32 %v204_v38, %v203_v24 }
  0x31   :  { %v150_v22 = vrot.slane %v149_v57, 2  ;;  %v164_v23 = vrot.slane %v163_v58, 2  ;;  %v178_v25 = vrot.slane %v177_v59, 2  ;;  %v219_v27 = vadd.f32 %v218_v49, %v217_v37 }
  0x32   :  { %v123_v28 = vadd.f32 %v122_v13, %v121_v63  ;;  %v137_v30 = vadd.f32 %v136_v14, %v135_v48  ;;  %v192_v33 = vrot.slane %v191_v18, 2  ;;  %v206_v34 = vrot.slane %v205_v21, 2  ;;  %v268_v48 = vld [vmem:[#allocation5 + $0x30] sm:$0xff] }
  0x33   :  { %v151_v35 = vadd.f32 %v150_v22, %v149_v57  ;;  %v165_v36 = vadd.f32 %v164_v23, %v163_v58  ;;  %v179_v39 = vadd.f32 %v178_v25, %v177_v59  ;;  %v220_v40 = vrot.slane %v219_v27, 2 }
  0x34   :  { %v124_v61 = vrot.slane %v123_v28, 1  ;;  %v138_v62 = vrot.slane %v137_v30, 1  ;;  %v193_v56 = vadd.f32 %v192_v33, %v191_v18  ;;  %v207_v41 = vadd.f32 %v206_v34, %v205_v21 }
  0x35   :  { %v152_v42 = vrot.slane %v151_v35, 1  ;;  %v166_v46 = vrot.slane %v165_v36, 1  ;;  %v180_v53 = vrot.slane %v179_v39, 1  ;;  %v221_v60 = vadd.f32 %v220_v40, %v219_v27 }
  0x36   :  { %v125_v19 = vadd.f32 %v124_v61, %v123_v28  ;;  %v139_v24 = vadd.f32 %v138_v62, %v137_v30  ;;  %v194_v37 = vrot.slane %v193_v56, 1  ;;  %v208_v63 = vrot.slane %v207_v41, 1 }
  0x37   :  { %v153_v29 = vadd.f32 %v152_v42, %v151_v35  ;;  %v167_v38 = vadd.f32 %v166_v46, %v165_v36  ;;  %v181_v57 = vadd.f32 %v180_v53, %v179_v39  ;;  %v222_v58 = vrot.slane %v221_v60, 1 }
  0x38   :  { %v195_v59 = vadd.f32 %v194_v37, %v193_v56  ;;  %v209_v49 = vadd.f32 %v208_v63, %v207_v41  ;;  %v254_v13 = vsel %vm240_vm0, %v139_v24, %v125_v19  ;;  %v270_v14 = vmul.f32 %v266_v47, %v584_v0 }
  0x39   :  { %v223_v18 = vadd.f32 %v222_v58, %v221_v60  ;;  %v255_v21 = vsel %vm242_vm1, %v153_v29, %v254_v13  ;;  %v272_v22 = vmul.f32 %v268_v48, %v586_v1  ;;  %v274_v23 = vmul.f32 %v266_v47, %v588_v2 }
  0x3a   :  { %v256_v25 = vsel %vm244_vm2, %v167_v38, %v255_v21  ;;  %v276_v27 = vmul.f32 %v268_v48, %v590_v3  ;;  %v278_v28 = vmul.f32 %v266_v47, %v592_v4  ;;  %v280_v30 = vmul.f32 %v268_v48, %v594_v5 }
  0x3b   :  { %v257_v33 = vsel %vm246_vm3, %v181_v57, %v256_v25  ;;  %v282_v34 = vmul.f32 %v266_v47, %v596_v6  ;;  %v284_v0 = vmul.f32 %v268_v48, %v598_v7  ;;  %v286_v35 = vmul.f32 %v266_v47, %v600_v8 }
  0x3c   :  { %v258_v1 = vsel %vm248_vm4, %v195_v59, %v257_v33  ;;  %v288_v2 = vmul.f32 %v268_v48, %v602_v9  ;;  %v290_v36 = vmul.f32 %v266_v47, %v604_v10  ;;  %v292_v3 = vmul.f32 %v268_v48, %v606_v11 }
  0x3d   :  { %v259_v4 = vsel %vm250_vm5, %v209_v49, %v258_v1  ;;  %v294_v5 = vmul.f32 %v266_v47, %v608_v12  ;;  %v296_v39 = vmul.f32 %v268_v48, %v610_v15  ;;  %v298_v6 = vmul.f32 %v266_v47, %v612_v16 }
  0x3e   :  { %v260_v7 = vsel %vm252_vm6, %v223_v18, %v259_v4  ;;  %v300_v8 = vmul.f32 %v268_v48, %v614_v17  ;;  %v302_v40 = vadd.f32 %v272_v22, %v270_v14  ;;  %v316_v61 = vadd.f32 %v276_v27, %v274_v23  ;;  %v267_v4 = vld [vmem:[#allocation5 + $0x28] sm:$0xff] }
  0x3f   :  { %264 = vst [vmem:[#allocation7 + $0x8] sm:$0xff] %v260_v7  ;;  %v330_v9 = vadd.f32 %v280_v30, %v278_v28  ;;  %v344_v62 = vadd.f32 %v284_v0, %v282_v34  ;;  %v358_v10 = vadd.f32 %v288_v2, %v286_v35  ;;  %v372_v56 = vadd.f32 %v292_v3, %v290_v36 }
  0x40   :  { %v303_v11 = vrot.slane %v302_v40, 4  ;;  %v317_v41 = vrot.slane %v316_v61, 4  ;;  %v386_v42 = vadd.f32 %v296_v39, %v294_v5  ;;  %v400_v46 = vadd.f32 %v300_v8, %v298_v6  ;;  %v269_v8 = vld [vmem:[#allocation5 + $0x38] sm:$0xff] }
  0x41   :  { %v331_v12 = vrot.slane %v330_v9, 4  ;;  %v345_v53 = vrot.slane %v344_v62, 4  ;;  %v359_v15 = vrot.slane %v358_v10, 4  ;;  %v373_v60 = vrot.slane %v372_v56, 4 }
  0x42   :  { %v304_v16 = vadd.f32 %v303_v11, %v302_v40  ;;  %v318_v47 = vadd.f32 %v317_v41, %v316_v61  ;;  %v387_v19 = vrot.slane %v386_v42, 4  ;;  %v401_v24 = vrot.slane %v400_v46, 4 }
  0x43   :  { %v332_v17 = vadd.f32 %v331_v12, %v330_v9  ;;  %v346_v37 = vadd.f32 %v345_v53, %v344_v62  ;;  %v360_v63 = vadd.f32 %v359_v15, %v358_v10  ;;  %v374_v48 = vadd.f32 %v373_v60, %v372_v56 }
  0x44   :  { %v305_v29 = vrot.slane %v304_v16, 2  ;;  %v319_v38 = vrot.slane %v318_v47, 2  ;;  %v388_v57 = vadd.f32 %v387_v19, %v386_v42  ;;  %v402_v58 = vadd.f32 %v401_v24, %v400_v46 }
  0x45   :  { %v333_v59 = vrot.slane %v332_v17, 2  ;;  %v347_v49 = vrot.slane %v346_v37, 2  ;;  %v361_v13 = vrot.slane %v360_v63, 2  ;;  %v375_v14 = vrot.slane %v374_v48, 2 }
  0x46   :  { %v306_v18 = vadd.f32 %v305_v29, %v304_v16  ;;  %v320_v21 = vadd.f32 %v319_v38, %v318_v47  ;;  %v389_v22 = vrot.slane %v388_v57, 2  ;;  %v403_v23 = vrot.slane %v402_v58, 2  ;;  %v760_v29 = vld [vmem:[#allocation14_spill] sm:$0xff] }
  0x47   :  { %v334_v25 = vadd.f32 %v333_v59, %v332_v17  ;;  %v348_v27 = vadd.f32 %v347_v49, %v346_v37  ;;  %v362_v28 = vadd.f32 %v361_v13, %v360_v63  ;;  %v376_v30 = vadd.f32 %v375_v14, %v374_v48  ;;  %v757_v17 = vld [vmem:[#allocation11_spill] sm:$0xff]  ;;  %v758_v63 = vld [vmem:[#allocation12_spill] sm:$0xff]  ;;  %v759_v48 = vld [vmem:[#allocation13_spill] sm:$0xff] }
  0x48   :  { %v307_v33 = vrot.slane %v306_v18, 1  ;;  %v321_v34 = vrot.slane %v320_v21, 1  ;;  %v390_v0 = vadd.f32 %v389_v22, %v388_v57  ;;  %v404_v35 = vadd.f32 %v403_v23, %v402_v58 }
  0x49   :  { %v335_v1 = vrot.slane %v334_v25, 1  ;;  %v349_v2 = vrot.slane %v348_v27, 1  ;;  %v363_v36 = vrot.slane %v362_v28, 1  ;;  %v377_v3 = vrot.slane %v376_v30, 1 }
  0x4a   :  { %v308_v5 = vadd.f32 %v307_v33, %v306_v18  ;;  %v322_v39 = vadd.f32 %v321_v34, %v320_v21  ;;  %v391_v6 = vrot.slane %v390_v0, 1  ;;  %v405_v7 = vrot.slane %v404_v35, 1 }
  0x4b   :  { %v336_v40 = vadd.f32 %v335_v1, %v334_v25  ;;  %v350_v61 = vadd.f32 %v349_v2, %v348_v27  ;;  %v364_v9 = vadd.f32 %v363_v36, %v362_v28  ;;  %v378_v62 = vadd.f32 %v377_v3, %v376_v30 }
  0x4c   :  { %v392_v10 = vadd.f32 %v391_v6, %v390_v0  ;;  %v406_v56 = vadd.f32 %v405_v7, %v404_v35  ;;  %v430_v11 = vsel %vm240_vm0, %v322_v39, %v308_v5  ;;  %v271_v41 = vmul.f32 %v267_v4, %v632_v26 }
  0x4d   :  { %v431_v42 = vsel %vm242_vm1, %v336_v40, %v430_v11  ;;  %v273_v46 = vmul.f32 %v269_v8, %v634_v31  ;;  %v275_v12 = vmul.f32 %v267_v4, %v636_v32  ;;  %v277_v53 = vmul.f32 %v269_v8, %v638_v43 }
  0x4e   :  { %v432_v15 = vsel %vm244_vm2, %v350_v61, %v431_v42  ;;  %v279_v60 = vmul.f32 %v267_v4, %v640_v44  ;;  %v281_v16 = vmul.f32 %v269_v8, %v642_v45  ;;  %v283_v47 = vmul.f32 %v267_v4, %v644_v50 }
  0x4f   :  { %v433_v19 = vsel %vm246_vm3, %v364_v9, %v432_v15  ;;  %v285_v26 = vmul.f32 %v269_v8, %v646_v51  ;;  %v287_v24 = vmul.f32 %v267_v4, %v648_v52  ;;  %v289_v31 = vmul.f32 %v269_v8, %v651_v54 }
  0x50   :  { %v434_v32 = vsel %vm248_vm4, %v378_v62, %v433_v19  ;;  %v291_v43 = vmul.f32 %v267_v4, %v653_v55  ;;  %v293_v37 = vmul.f32 %v269_v8, %v757_v17  ;;  %v295_v44 = vmul.f32 %v267_v4, %v758_v63 }
  0x51   :  { %v435_v45 = vsel %vm250_vm5, %v392_v10, %v434_v32  ;;  %v297_v50 = vmul.f32 %v269_v8, %v759_v48  ;;  %v299_v38 = vmul.f32 %v267_v4, %v760_v29  ;;  %v301_v51 = vmul.f32 %v269_v8, %v671_v20 }
  0x52   :  { %v436_v52 = vsel %vm252_vm6, %v406_v56, %v435_v45  ;;  %v309_v57 = vadd.f32 %v273_v46, %v271_v41  ;;  %v323_v54 = vadd.f32 %v277_v53, %v275_v12  ;;  %v337_v58 = vadd.f32 %v281_v16, %v279_v60 }
  0x53   :  { %447 = vst [vmem:[#allocation7 + $0x10] sm:$0xff] %v436_v52  ;;  %v351_v59 = vadd.f32 %v285_v26, %v283_v47  ;;  %v365_v55 = vadd.f32 %v289_v31, %v287_v24  ;;  %v379_v49 = vadd.f32 %v293_v37, %v291_v43  ;;  %v393_v13 = vadd.f32 %v297_v50, %v295_v44 }
  0x54   :  { %v310_v14 = vrot.slane %v309_v57, 4  ;;  %v324_v18 = vrot.slane %v323_v54, 4  ;;  %v338_v21 = vrot.slane %v337_v58, 4  ;;  %v407_v22 = vadd.f32 %v301_v51, %v299_v38 }
  0x55   :  { %v352_v23 = vrot.slane %v351_v59, 4  ;;  %v366_v25 = vrot.slane %v365_v55, 4  ;;  %v380_v27 = vrot.slane %v379_v49, 4  ;;  %v394_v28 = vrot.slane %v393_v13, 4 }
  0x56   :  { %v311_v30 = vadd.f32 %v310_v14, %v309_v57  ;;  %v325_v20 = vadd.f32 %v324_v18, %v323_v54  ;;  %v339_v33 = vadd.f32 %v338_v21, %v337_v58  ;;  %v408_v34 = vrot.slane %v407_v22, 4 }
  0x57   :  { %v353_v0 = vadd.f32 %v352_v23, %v351_v59  ;;  %v367_v35 = vadd.f32 %v366_v25, %v365_v55  ;;  %v381_v1 = vadd.f32 %v380_v27, %v379_v49  ;;  %v395_v2 = vadd.f32 %v394_v28, %v393_v13 }
  0x58   :  { %v312_v36 = vrot.slane %v311_v30, 2  ;;  %v326_v3 = vrot.slane %v325_v20, 2  ;;  %v340_v4 = vrot.slane %v339_v33, 2  ;;  %v409_v5 = vadd.f32 %v408_v34, %v407_v22 }
  0x59   :  { %v354_v39 = vrot.slane %v353_v0, 2  ;;  %v368_v6 = vrot.slane %v367_v35, 2  ;;  %v382_v7 = vrot.slane %v381_v1, 2  ;;  %v396_v8 = vrot.slane %v395_v2, 2 }
  0x5a   :  { %v313_v40 = vadd.f32 %v312_v36, %v311_v30  ;;  %v327_v61 = vadd.f32 %v326_v3, %v325_v20  ;;  %v341_v9 = vadd.f32 %v340_v4, %v339_v33  ;;  %v410_v62 = vrot.slane %v409_v5, 2 }
  0x5b   :  { %v355_v10 = vadd.f32 %v354_v39, %v353_v0  ;;  %v369_v56 = vadd.f32 %v368_v6, %v367_v35  ;;  %v383_v11 = vadd.f32 %v382_v7, %v381_v1  ;;  %v397_v41 = vadd.f32 %v396_v8, %v395_v2 }
  0x5c   :  { %v314_v42 = vrot.slane %v313_v40, 1  ;;  %v328_v46 = vrot.slane %v327_v61, 1  ;;  %v342_v12 = vrot.slane %v341_v9, 1  ;;  %v411_v53 = vadd.f32 %v410_v62, %v409_v5 }
  0x5d   :  { %v356_v15 = vrot.slane %v355_v10, 1  ;;  %v370_v60 = vrot.slane %v369_v56, 1  ;;  %v384_v16 = vrot.slane %v383_v11, 1  ;;  %v398_v47 = vrot.slane %v397_v41, 1 }
  0x5e   :  { %v315_v19 = vadd.f32 %v314_v42, %v313_v40  ;;  %v329_v26 = vadd.f32 %v328_v46, %v327_v61  ;;  %v343_v24 = vadd.f32 %v342_v12, %v341_v9  ;;  %v412_v31 = vrot.slane %v411_v53, 1 }
  0x5f   :  { %v357_v32 = vadd.f32 %v356_v15, %v355_v10  ;;  %v371_v43 = vadd.f32 %v370_v60, %v369_v56  ;;  %v385_v17 = vadd.f32 %v384_v16, %v383_v11  ;;  %v399_v63 = vadd.f32 %v398_v47, %v397_v41 }
  0x60   :  { %v437_v37 = vsel %vm240_vm0, %v329_v26, %v315_v19  ;;  %v413_v45 = vadd.f32 %v412_v31, %v411_v53 }
  0x61   :  { %v438_v44 = vsel %vm242_vm1, %v343_v24, %v437_v37 }
  0x62   :  { %v439_v48 = vsel %vm244_vm2, %v357_v32, %v438_v44 }
  0x63   :  { %v440_v50 = vsel %vm246_vm3, %v371_v43, %v439_v48 }
  0x64   :  { %v441_v29 = vsel %vm248_vm4, %v385_v17, %v440_v50 }
  0x65   :  { %v442_v38 = vsel %vm250_vm5, %v399_v63, %v441_v29 }
  0x66   :  { %v443_v51 = vsel %vm252_vm6, %v413_v45, %v442_v38 }
  0x67   :  { %448 = vst [vmem:[#allocation7 + $0x18] sm:$0xff] %v443_v51 }
  0x68   :  { %461 = dma.vmem_to_hbm [thread:$0]  %s454_s1, 512, %s456_s23, [#allocation4], %s553_s17, %s553_s17, %s554_s18  }
  0x69   :  { %550 = dma.done.wait [#allocation4], 512  }
  0x6a   :  { %551 = vsyncadd [#allocation4], 4294966784 }
  0x6b   :  { %466 = vsyncpa [#allocation3], 1 }
  0x6c   :  { %467 = vsyncpa [#allocation6], 1 }
  0x6d   :  { %468 = vsyncpa [#allocation4], 1 }

</bundles_post_ra>
